<compile_context>
chip_gen: v6e
topology: v6e:2x2x1
jax: 0.10.0
libtpu: 0.0.40
codegen_flags: <defaults>
</compile_context>

<pallas_src>
import functools

import jax
import jax.numpy as jnp
from jax.experimental import pallas as pl
from jax.experimental.pallas import tpu as pltpu


_LANE = 128


def _quantize_kernel(s_ref, x_ref, o_ref, *, qn, qp):
    """Elementwise power-of-two quantize/dequantize of one (tile_r, W) tile."""
    pow2_scale = s_ref[0]   # 2 ** round(log2(|scale|))
    inv_scale = s_ref[1]    # exact reciprocal (also a power of two)
    x = x_ref[...].astype(jnp.float32)
    xs = jnp.clip(x * inv_scale, jnp.float32(qn), jnp.float32(qp))
    x_bar = jnp.round(xs)                          # round-half-to-even == torch.round
    o_ref[...] = (x_bar * pow2_scale).astype(o_ref.dtype)


def _block_config():
    """(target_block_bytes, vmem_limit_bytes) chosen per TPU generation."""
    kind = ""
    try:
        kind = jax.devices()[0].device_kind.lower()
    except Exception:  # pragma: no cover - defensive only
        pass
    is_v5e = ("v5 lite" in kind) or ("v5e" in kind) or ("v5lite" in kind)
    if (not is_v5e) and (("v6" in kind) or ("v7" in kind)):
        # v6e: 32 MiB default scoped / 128 MiB physical; v7x: 64 MiB physical.
        # 6 MiB blocks -> 24 MiB double-buffered in+out footprint; cap explicitly.
        return 6 * 1024 * 1024, 48 * 1024 * 1024
    # v5e (16 MiB default scoped VMEM, ~820 GB/s HBM) and unknown chips:
    # 2 MiB blocks -> 8 MiB footprint, already near v5e roofline.
    return 2 * 1024 * 1024, None


def _choose_layout(n_main, itemsize, target_block_bytes):
    """Pick (lanes, rows, tile_r) for a lane-dense 2-D view of n_main elements.

    n_main is guaranteed to be a multiple of 128.
    """
    lanes = _LANE
    for w in (1024, 512, 256, 128):          # widest lane extent that divides cleanly
        if n_main % w == 0:
            lanes = w
            break
    rows = n_main // lanes
    sub = max(8, 32 // itemsize)             # min sublane tile: 8 f32 / 16 bf16 / 32 i8
    target_rows = max(sub, (target_block_bytes // (lanes * itemsize)) // sub * sub)
    if rows <= target_rows:
        tile_r = rows                        # single block == full array dims (legal)
    else:
        tile_r = target_rows                 # multiple of sub; ragged last block masked
    return lanes, rows, tile_r


def _quantize_2d(x2d, scalars, qn, qp, tile_r, vmem_limit):
    R, W = x2d.shape
    itemsize = jnp.dtype(x2d.dtype).itemsize
    kernel = functools.partial(_quantize_kernel, qn=qn, qp=qp)
    cparams = dict(dimension_semantics=("parallel",))
    # TODO(synk): on v7x, verify "parallel" actually shards the row grid across
    # both TensorCores; if not, switch this axis to pltpu.CORE_PARALLEL.
    if vmem_limit is not None:
        cparams["vmem_limit_bytes"] = vmem_limit
    return pl.pallas_call(
        kernel,
        out_shape=jax.ShapeDtypeStruct(x2d.shape, x2d.dtype),
        grid_spec=pltpu.PrefetchScalarGridSpec(
            num_scalar_prefetch=1,           # scalars land in SMEM once, before the grid
            grid=(pl.cdiv(R, tile_r),),
            in_specs=[pl.BlockSpec((tile_r, W), lambda i, s: (i, 0))],
            out_specs=pl.BlockSpec((tile_r, W), lambda i, s: (i, 0)),
        ),
        compiler_params=pltpu.CompilerParams(**cparams),
        cost_estimate=pl.CostEstimate(
            flops=6 * R * W,
            transcendentals=0,
            bytes_accessed=2 * R * W * itemsize,
        ),
    )(scalars, x2d)


def _quantize_jnp(x, pow2_scale, inv_scale, qn, qp):
    """Tiny plain-jnp fallback for <128-element tails / tiny inputs."""
    xs = jnp.clip(x.astype(jnp.float32) * inv_scale, jnp.float32(qn), jnp.float32(qp))
    return (jnp.round(xs) * pow2_scale).astype(x.dtype)


def int_quantizer_forward(x, scale, *, bits=4, all_positive=False):
    """JAX/Pallas equivalent of INT_Quantizer.forward.

    x     : float array, NCHW (or any shape).
    scale : float array of shape (1,) (the nn.Parameter).
    """
    if all_positive:
        qn, qp = 0, 2 ** bits - 1
    else:
        qn, qp = -(2 ** (bits - 1)), 2 ** (bits - 1) - 1

    # round_scale2pow2 (scalar glue, plain JAX):
    s = jnp.abs(jnp.asarray(scale, jnp.float32)).reshape(())
    log2_round = jnp.round(jnp.log2(s))
    pow2_scale = jnp.exp2(log2_round)
    inv_scale = jnp.exp2(-log2_round)            # exact reciprocal of a power of two
    scalars = jnp.stack([pow2_scale, inv_scale])  # (2,) f32, prefetched into SMEM
    # TODO(synk): decimal_num / integer_num buffer bookkeeping (update_params) is
    # stateful module bookkeeping and does not affect the forward output.

    orig_shape = x.shape
    n = x.size
    itemsize = jnp.dtype(x.dtype).itemsize
    target_block_bytes, vmem_limit = _block_config()

    n_tail = n % _LANE
    n_main = n - n_tail

    if n_main == 0:
        # Entire input is smaller than one lane row; not worth a kernel launch.
        return _quantize_jnp(x.reshape(-1), pow2_scale, inv_scale, qn, qp).reshape(orig_shape)

    lanes, rows, tile_r = _choose_layout(n_main, itemsize, target_block_bytes)

    if n_tail == 0:
        # Common case: pure bitcast reshape in/out, no extra HBM traffic.
        x2d = x.reshape(rows, lanes)
        out2d = _quantize_2d(x2d, scalars, qn, qp, tile_r, vmem_limit)
        return out2d.reshape(orig_shape)

    # Misaligned case: quantize the 128-aligned prefix in the kernel and the
    # (<128-element) tail with plain jnp, then stitch the flat output back.
    flat = x.reshape(-1)
    main2d = flat[:n_main].reshape(rows, lanes)
    out_main = _quantize_2d(main2d, scalars, qn, qp, tile_r, vmem_limit).reshape(-1)
    out_tail = _quantize_jnp(flat[n_main:], pow2_scale, inv_scale, qn, qp)
    return jnp.concatenate([out_main, out_tail]).reshape(orig_shape)


if __name__ == "__main__":
    key = jax.random.PRNGKey(0)
    kx, ks, kt = jax.random.split(key, 3)

    bits = 4
    all_positive = False
    qn, qp = -(2 ** (bits - 1)), 2 ** (bits - 1) - 1

    # Non-trivial positive scale so the pow2 rounding path is exercised.
    scale = jnp.array([0.07], dtype=jnp.float32)
    p2 = jnp.exp2(jnp.round(jnp.log2(jnp.abs(scale))))

    # 1) NCHW activation, small aligned shape (2*4*16*16 = 2048 elements).
    x = jax.random.normal(kx, (2, 4, 16, 16), dtype=jnp.float32) * 0.3
    out = jax.block_until_ready(int_quantizer_forward(x, scale, bits=bits,
                                                      all_positive=all_positive))
    ref = jnp.round(jnp.clip(x / p2, qn, qp)) * p2
    assert out.shape == x.shape and out.dtype == x.dtype
    assert jnp.allclose(out, ref, atol=1e-6), "mismatch vs reference (aligned)"

    # 2) Misaligned element count (3*5*13 = 195) exercises the prefix + tail path.
    x2 = jax.random.normal(kt, (3, 5, 13), dtype=jnp.float32) * 0.3
    out2 = jax.block_until_ready(int_quantizer_forward(x2, scale, bits=bits,
                                                       all_positive=all_positive))
    ref2 = jnp.round(jnp.clip(x2 / p2, qn, qp)) * p2
    assert out2.shape == x2.shape and out2.dtype == x2.dtype
    assert jnp.allclose(out2, ref2, atol=1e-6), "mismatch vs reference (misaligned)"

    print("KERNEL_OK")
</pallas_src>

<mosaic_0001>
module attributes {stable_mosaic.version = 11 : i64} {
  func.func @_quantize_kernel(%arg0: i32, %arg1: memref<2xf32, #tpu.memory_space<smem>>, %arg2: memref<2x1024xf32, #tpu.memory_space<vmem>>, %arg3: memref<2x1024xf32, #tpu.memory_space<vmem>>) attributes {dimension_semantics = [#tpu.dimension_semantics<parallel>], iteration_bounds = array<i64: 1>, scalar_prefetch = 1 : i64, scratch_operands = 0 : i64, tpu.core_type = #tpu.core_type<tc>, window_params = [{transform_indices = @transform_0, window_bounds = array<i64: 2, 1024>}, {transform_indices = @transform_1, window_bounds = array<i64: 2, 1024>}]} {
    %c0 = arith.constant 0 : index
    %0 = memref.load %arg1[%c0] : memref<2xf32, #tpu.memory_space<smem>>
    %c1 = arith.constant 1 : index
    %1 = memref.load %arg1[%c1] : memref<2xf32, #tpu.memory_space<smem>>
    %c0_0 = arith.constant 0 : index
    %c0_1 = arith.constant 0 : index
    %2 = vector.load %arg2[%c0_0, %c0_1] : memref<2x1024xf32, #tpu.memory_space<vmem>>, vector<2x1024xf32>
    %3 = vector.broadcast %1 : f32 to vector<2x1024xf32>
    %4 = arith.mulf %2, %3 : vector<2x1024xf32>
    %cst = arith.constant -8.000000e+00 : f32
    %cst_2 = arith.constant 7.000000e+00 : f32
    %5 = vector.broadcast %cst : f32 to vector<2x1024xf32>
    %6 = arith.maximumf %5, %4 : vector<2x1024xf32>
    %7 = vector.broadcast %cst_2 : f32 to vector<2x1024xf32>
    %8 = arith.minimumf %7, %6 : vector<2x1024xf32>
    %9 = math.roundeven %8 : vector<2x1024xf32>
    %10 = vector.broadcast %0 : f32 to vector<2x1024xf32>
    %11 = arith.mulf %9, %10 : vector<2x1024xf32>
    %c0_3 = arith.constant 0 : index
    %c0_4 = arith.constant 0 : index
    %12 = vector.load %arg3[%c0_3, %c0_4] : memref<2x1024xf32, #tpu.memory_space<vmem>>, vector<2x1024xf32>
    tpu.vector_store %arg3[%c0_3, %c0_4], %11 {strides = array<i32>} : memref<2x1024xf32, #tpu.memory_space<vmem>>, vector<2x1024xf32>,
    return
  }
  func.func @transform_0(%arg0: i32, %arg1: memref<2xf32, #tpu.memory_space<smem>>) -> (i32, i32) {
    %c0_i32 = arith.constant 0 : i32
    %c0_i32_0 = arith.constant 0 : i32
    return %arg0, %c0_i32 : i32, i32
  }
  func.func @transform_1(%arg0: i32, %arg1: memref<2xf32, #tpu.memory_space<smem>>) -> (i32, i32) {
    %c0_i32 = arith.constant 0 : i32
    %c0_i32_0 = arith.constant 0 : i32
    return %arg0, %c0_i32 : i32, i32
  }
}

</mosaic_0001>

<bundles_post_ra>
// kernel: tpu_custom_call.1
= control target key start
LH: loop header
LB: loop body
LE: loop exit
PB: predicated region body
PF: predicated region fallthrough
CT: control target
= control target key end

     0   :  { %s133_s9 = smov [#allocation3]   ;;  %s160_s0 = inlined_call_operand.hbm [shape: f32[2], index: 0, kind: input, shape index: {}]   ;;  %s161_s1 = inlined_call_operand.hbm [shape: f32[2,1024], index: 1, kind: input, shape index: {}]   ;;  %s162_s2 = inlined_call_operand.hbm [shape: f32[2,1024], index: 2, kind: output, shape index: {}]  }
   0x1   :  { %8 = dma.hbm_to_smem %s160_s0, 16, %s133_s9, [#allocation2] }
   0x2   :  { %127 = dma.done.wait [#allocation2], 16 }
   0x3   :  { %128 = vsyncadd [#allocation2], 4294967280 }
   0x4   :  { %10 = sfence }
   0x5   :  { %11 = vsyncpa [#allocation5], 0 }
   0x6   :  { %12 = vsyncpa [#allocation6], 0  ;;  %s134_s12 = smov [#allocation4]  }
   0x7   :  { %s19_s13 = sshll.u32 %s134_s12, 4  ;;  %s20_s13 = int_to_ptr.vmem [resolvable:$true] %s19_s13 }
   0x8   :  { %s95_s14 = scalar_lea.vmem %s20_s13, 256  ;;  %p100_p1 = scmp.lt.s32.totalorder %s20_s13, %s20_s13 }
   0x9   :  { %p96_p0 = scmp.ne.s32.totalorder %s20_s13, %s95_s14  ;;  %p101_p2 = scmp.lt.s32.totalorder %s95_s14, %s95_s14 }
   0xb   :  { %p102_p3 = por %p101_p2, %p100_p1 }
   0xd   :  { %p103_p4 = pnand %p102_p3, %p96_p0 }
   0xf   :  { %106 = shalt.err (!%p103_p4)
}
  0x10   :  { %22 = dma.hbm_to_vmem [thread:$0]  %s161_s1, 256, %s20_s13, [#allocation5]  }
  0x11   :  { %129 = dma.done.wait [#allocation5], 256  }
  0x12   :  { %130 = vsyncadd [#allocation5], 4294967040  ;;  %s59_s0 = sld [smem:[#allocation3 + $0x1]]  ;;  %v28_v0 = vld [vmem:[#allocation4] sm:$0xff]  ;;  %v29_v2 = vld [vmem:[#allocation4 + $0x8] sm:$0xff]  ;;  %s135_s1 = smov [#allocation7]  }
  0x13   :  { %s26_s17 = sld [smem:[#allocation3]]  ;;  %s50_s18 = sshll.u32 %s135_s1, 4  ;;  %s51_s18 = int_to_ptr.vmem [resolvable:$true] %s50_s18 }
  0x14   :  { %s107_s19 = scalar_lea.vmem %s51_s18, 256  ;;  %p112_p6 = scmp.lt.s32.totalorder %s51_s18, %s51_s18 }
  0x15   :  { %p108_p5 = scmp.ne.s32.totalorder %s51_s18, %s107_s19  ;;  %p113_p7 = scmp.lt.s32.totalorder %s107_s19, %s107_s19 }
  0x17   :  { %p114_p8 = por %p113_p7, %p112_p6 }
  0x18   :  { %v30_v1 = vstv %s59_s0 }
  0x19   :  { %v31_v3 = vmul.f32 %v30_v1, %v28_v0  ;;  %v32_v4 = vmul.f32 %v30_v1, %v29_v2  ;;  %v39_v20 = vstv %s26_s17  ;;  %p115_p9 = pnand %p114_p8, %p108_p5 }
  0x1b   :  { %v33_v5 = vmax.f32 %v31_v3, -8.0  ;;  %v34_v6 = vmax.f32 %v32_v4, -8.0 }
  0x1d   :  { %v35_v7 = vmin.f32 %v33_v5, 7.0  ;;  %v36_v8 = vmin.f32 %v34_v6, 7.0 }
  0x1f   :  { %v62_v9 = vcvt.f32.s32 %v35_v7  ;;  %v60_v10 = vand.u32 2147483647, %v35_v7  ;;  %v70_v11 = vcvt.f32.s32 %v36_v8  ;;  %v65_v13 = vand.u32 2147483648, %v35_v7 }
  0x20   :  { %v68_v14 = vand.u32 2147483647, %v36_v8  ;;  %v73_v16 = vand.u32 2147483648, %v36_v8 }
  0x21   :  { %v63_v12 = vcvt.s32.f32 %v62_v9  ;;  %v71_v15 = vcvt.s32.f32 %v70_v11  ;;  %vm61_vm0 = vcmp.lt.f32.partialorder %v60_v10, 8388608.0 }
  0x22   :  { %vm69_vm1 = vcmp.lt.f32.partialorder %v68_v14, 8388608.0 }
  0x23   :  { %v64_v17 = vand.u32 2147483647, %v63_v12  ;;  %v72_v18 = vand.u32 2147483647, %v71_v15 }
  0x25   :  { %v66_v19 = vor.u32 %v65_v13, %v64_v17  ;;  %v74_v21 = vor.u32 %v73_v16, %v72_v18 }
  0x27   :  { %v67_v22 = vsel %vm61_vm0, %v66_v19, %v35_v7  ;;  %v75_v24 = vsel %vm69_vm1, %v74_v21, %v36_v8 }
  0x28   :  { %v40_v23 = vmul.f32 %v67_v22, %v39_v20  ;;  %v41_v25 = vmul.f32 %v75_v24, %v39_v20 }
  0x2a   :  { %42 = vst [vmem:[#allocation7] sm:$0xff] %v40_v23  ;;  %43 = vst [vmem:[#allocation7 + $0x8] sm:$0xff] %v41_v25 }
  0x2b   :  { %118 = shalt.err (!%p115_p9)
}
  0x2c   :  { %53 = dma.vmem_to_hbm [thread:$0]  %s51_s18, 256, %s162_s2, [#allocation6]  }
  0x2d   :  { %131 = dma.done.wait [#allocation6], 256  }
  0x2e   :  { %132 = vsyncadd [#allocation6], 4294967040 }
  0x2f   :  { %57 = vsyncpa [#allocation5], 1 }
  0x30   :  { %58 = vsyncpa [#allocation6], 1 }

</bundles_post_ra>
